<compile_context>
chip_gen: v7x
topology: tpu7x:2x2x1
jax: 0.10.0
libtpu: 0.0.40
codegen_flags: <defaults>
</compile_context>

<pallas_src>
from functools import partial

import jax
import jax.numpy as jnp
from jax import lax
from jax.experimental import pallas as pl
from jax.experimental.pallas import tpu as pltpu


def decoder_kernel(x_ref, w1_ref, b1_ref, w2t_ref, b2t_ref, ot_ref, *, mxu_dtype):
    # ---- Linear 1 (MXU) + LeakyReLU(0.1) (VPU, f32) ----
    x = x_ref[...].astype(mxu_dtype)                      # (TB, D_in)
    w1 = w1_ref[...].astype(mxu_dtype)                    # (D_in, H)
    h = jnp.dot(x, w1, preferred_element_type=jnp.float32) + b1_ref[...]   # (TB, H) f32
    h = jnp.where(h > 0, h, 0.1 * h)                      # LeakyReLU(negative_slope=0.1)
    # Dropout(p=0) is the identity in both train and eval -> elided.

    # ---- Linear 2, computed transposed so the output is lane-dense ----
    # logits_t[o, b] = sum_h w2t[o, h] * h[b, h]
    logits_t = lax.dot_general(
        w2t_ref[...].astype(mxu_dtype), h.astype(mxu_dtype),
        dimension_numbers=(((1,), (1,)), ((), ())),
        preferred_element_type=jnp.float32,
    ) + b2t_ref[...]                                      # (D_out, TB) f32

    # ---- Numerically stable softmax over the class axis (PyTorch dim=1) ----
    # Class axis is now axis 0 (2 sublane rows) -> cheap reduce; lanes stay dense.
    m = jnp.max(logits_t, axis=0, keepdims=True)          # (1, TB)
    e = jnp.exp(logits_t - m)                             # EUP
    denom = jnp.sum(e, axis=0, keepdims=True)             # (1, TB)
    # Exact divide (not approx vrcp) so probabilities sum to 1 to f32 accuracy.
    ot_ref[...] = e / denom


def decoder_forward(x, w1, b1, w2t, b2t, *, block_batch=512, mxu_dtype=jnp.float32):
    """x: (B, input_dim) f32.  Returns (B, output_dim) f32 softmax probabilities.

    w1:  (input_dim, hidden_dim)   == PyTorch linear.weight.T
    b1:  (1, hidden_dim)
    w2t: (output_dim, hidden_dim)  == PyTorch linear_out.weight
    b2t: (output_dim, 1)
    """
    batch, input_dim = x.shape
    hidden_dim = w1.shape[1]
    output_dim = w2t.shape[0]

    tb = int(block_batch)
    assert tb % 128 == 0, "batch tile must be a multiple of 128 (lane-dense output)"

    # Pad batch up to a multiple of the tile; padded rows are sliced off below.
    padded_b = pl.cdiv(batch, tb) * tb
    if padded_b != batch:
        x = jnp.pad(x, ((0, padded_b - batch), (0, 0)))

    grid = (padded_b // tb,)
    kernel = partial(decoder_kernel, mxu_dtype=mxu_dtype)

    out_t = pl.pallas_call(
        kernel,
        out_shape=jax.ShapeDtypeStruct((output_dim, padded_b), jnp.float32),
        grid=grid,
        in_specs=[
            # x: streamed one batch tile per grid step.
            pl.BlockSpec((tb, input_dim), lambda i: (i, 0)),
            # Weights / biases: constant block index -> VMEM-resident across steps.
            pl.BlockSpec((input_dim, hidden_dim), lambda i: (0, 0)),
            pl.BlockSpec((1, hidden_dim), lambda i: (0, 0)),
            pl.BlockSpec((output_dim, hidden_dim), lambda i: (0, 0)),
            pl.BlockSpec((output_dim, 1), lambda i: (0, 0)),
        ],
        # Lane-dense output slab: last dim is the batch tile (multiple of 128).
        out_specs=pl.BlockSpec((output_dim, tb), lambda i: (0, i)),
        compiler_params=pltpu.CompilerParams(
            dimension_semantics=("parallel",),
        ),
    )(x, w1, b1, w2t, b2t)

    # (output_dim, padded_B) -> (B, output_dim): wrapper-side layout plumbing.
    return out_t[:, :batch].T


def init_params(key, input_dim, hidden_dim, output_dim):
    """Deterministic synthetic parameter init (PyTorch-like uniform ranges)."""
    k1, k2, k3, k4 = jax.random.split(key, 4)
    lim1 = 1.0 / jnp.sqrt(input_dim)
    lim2 = 1.0 / jnp.sqrt(hidden_dim)
    w1 = jax.random.uniform(k1, (input_dim, hidden_dim), jnp.float32, -lim1, lim1)
    b1 = jax.random.uniform(k2, (1, hidden_dim), jnp.float32, -lim1, lim1)
    w2t = jax.random.uniform(k3, (output_dim, hidden_dim), jnp.float32, -lim2, lim2)
    b2t = jax.random.uniform(k4, (output_dim, 1), jnp.float32, -lim2, lim2)
    return w1, b1, w2t, b2t


if __name__ == "__main__":
    # Small shapes consistent with the module (input_dim=hidden_dim, output_dim=2).
    # batch=500 exercises the padding path; block_batch=128 gives a 4-step grid.
    batch, input_dim, hidden_dim, output_dim = 500, 128, 128, 2

    key = jax.random.PRNGKey(0)
    kx, kp = jax.random.split(key)
    x = jax.random.normal(kx, (batch, input_dim), jnp.float32)
    w1, b1, w2t, b2t = init_params(kp, input_dim, hidden_dim, output_dim)

    out = decoder_forward(x, w1, b1, w2t, b2t, block_batch=128)
    out = jax.block_until_ready(out)

    # Reference in plain JAX (same math as the PyTorch module).
    h_ref = x @ w1 + b1
    h_ref = jnp.where(h_ref > 0, h_ref, 0.1 * h_ref)
    logits_ref = h_ref @ w2t.T + b2t.T
    ref = jax.nn.softmax(logits_ref, axis=1)

    assert out.shape == (batch, output_dim)
    assert jnp.allclose(out, ref, atol=1e-5, rtol=1e-5)
    assert jnp.allclose(jnp.sum(out, axis=1), 1.0, atol=1e-5)

    print("KERNEL_OK")
</pallas_src>

<mosaic_0001>
module attributes {stable_mosaic.version = 11 : i64} {
  func.func @decoder_kernel(%arg0: i32, %arg1: memref<128x128xf32, #tpu.memory_space<vmem>>, %arg2: memref<128x128xf32, #tpu.memory_space<vmem>>, %arg3: memref<1x128xf32, #tpu.memory_space<vmem>>, %arg4: memref<2x128xf32, #tpu.memory_space<vmem>>, %arg5: memref<2x1xf32, #tpu.memory_space<vmem>>, %arg6: memref<2x128xf32, #tpu.memory_space<vmem>>) attributes {dimension_semantics = [#tpu.dimension_semantics<parallel>], iteration_bounds = array<i64: 4>, scalar_prefetch = 0 : i64, scratch_operands = 0 : i64, tpu.core_type = #tpu.core_type<tc>, window_params = [{transform_indices = @transform_0, window_bounds = array<i64: 128, 128>}, {pipeline_mode = #tpu.pipeline_mode<synchronous>, transform_indices = @transform_1, window_bounds = array<i64: 128, 128>}, {pipeline_mode = #tpu.pipeline_mode<synchronous>, transform_indices = @transform_2, window_bounds = array<i64: 1, 128>}, {pipeline_mode = #tpu.pipeline_mode<synchronous>, transform_indices = @transform_3, window_bounds = array<i64: 2, 128>}, {pipeline_mode = #tpu.pipeline_mode<synchronous>, transform_indices = @transform_4, window_bounds = array<i64: 2, 1>}, {transform_indices = @transform_5, window_bounds = array<i64: 2, 128>}]} {
    %c0 = arith.constant 0 : index
    %c0_0 = arith.constant 0 : index
    %0 = vector.load %arg1[%c0, %c0_0] : memref<128x128xf32, #tpu.memory_space<vmem>>, vector<128x128xf32>
    %c0_1 = arith.constant 0 : index
    %c0_2 = arith.constant 0 : index
    %1 = vector.load %arg2[%c0_1, %c0_2] : memref<128x128xf32, #tpu.memory_space<vmem>>, vector<128x128xf32>
    %cst = arith.constant dense<0.000000e+00> : vector<128x128xf32>
    %2 = tpu.matmul %0, %1, %cst {dimension_numbers = #tpu.dot_dimension_numbers<[1], [0], [0], [1], [0, 0, 1, 1], [], []>} : vector<128x128xf32>, vector<128x128xf32>, vector<128x128xf32> -> vector<128x128xf32>
    %c0_3 = arith.constant 0 : index
    %c0_4 = arith.constant 0 : index
    %3 = vector.load %arg3[%c0_3, %c0_4] : memref<1x128xf32, #tpu.memory_space<vmem>>, vector<1x128xf32>
    %4 = vector.broadcast %3 : vector<1x128xf32> to vector<128x128xf32>
    %5 = arith.addf %2, %4 : vector<128x128xf32>
    %cst_5 = arith.constant 0.000000e+00 : f32
    %6 = vector.broadcast %cst_5 : f32 to vector<128x128xf32>
    %7 = arith.cmpf ogt, %5, %6 : vector<128x128xf32>
    %cst_6 = arith.constant 1.000000e-01 : f32
    %8 = vector.broadcast %cst_6 : f32 to vector<128x128xf32>
    %9 = arith.mulf %8, %5 : vector<128x128xf32>
    %10 = arith.select %7, %5, %9 : vector<128x128xi1>, vector<128x128xf32>
    %c0_7 = arith.constant 0 : index
    %c0_8 = arith.constant 0 : index
    %11 = vector.load %arg4[%c0_7, %c0_8] : memref<2x128xf32, #tpu.memory_space<vmem>>, vector<2x128xf32>
    %cst_9 = arith.constant dense<0.000000e+00> : vector<2x128xf32>
    %12 = tpu.matmul %11, %10, %cst_9 {dimension_numbers = #tpu.dot_dimension_numbers<[1], [1], [0], [0], [0, 0, 1, 0], [], []>} : vector<2x128xf32>, vector<128x128xf32>, vector<2x128xf32> -> vector<2x128xf32>
    %c0_10 = arith.constant 0 : index
    %c0_11 = arith.constant 0 : index
    %13 = vector.load %arg5[%c0_10, %c0_11] : memref<2x1xf32, #tpu.memory_space<vmem>>, vector<2x1xf32>
    %14 = vector.broadcast %13 : vector<2x1xf32> to vector<2x128xf32>
    %15 = arith.addf %12, %14 : vector<2x128xf32>
    %cst_12 = arith.constant dense<0xFF800000> : vector<128xf32>
    %16 = vector.multi_reduction <maximumf>, %15, %cst_12 [0] : vector<2x128xf32> to vector<128xf32>
    %17 = vector.shape_cast %16 : vector<128xf32> to vector<1x128xf32>
    %18 = vector.broadcast %17 : vector<1x128xf32> to vector<2x128xf32>
    %19 = arith.subf %15, %18 : vector<2x128xf32>
    %20 = math.exp %19 : vector<2x128xf32>
    %cst_13 = arith.constant dense<0.000000e+00> : vector<128xf32>
    %21 = vector.multi_reduction <add>, %20, %cst_13 [0] : vector<2x128xf32> to vector<128xf32>
    %22 = vector.shape_cast %21 : vector<128xf32> to vector<1x128xf32>
    %23 = vector.broadcast %22 : vector<1x128xf32> to vector<2x128xf32>
    %24 = arith.divf %20, %23 : vector<2x128xf32>
    %c0_14 = arith.constant 0 : index
    %c0_15 = arith.constant 0 : index
    %25 = vector.load %arg6[%c0_14, %c0_15] : memref<2x128xf32, #tpu.memory_space<vmem>>, vector<2x128xf32>
    tpu.vector_store %arg6[%c0_14, %c0_15], %24 {strides = array<i32>} : memref<2x128xf32, #tpu.memory_space<vmem>>, vector<2x128xf32>,
    return
  }
  func.func @transform_0(%arg0: i32) -> (i32, i32) {
    %c0_i32 = arith.constant 0 : i32
    %c0_i32_0 = arith.constant 0 : i32
    return %arg0, %c0_i32 : i32, i32
  }
  func.func @transform_1(%arg0: i32) -> (i32, i32) {
    %c0_i32 = arith.constant 0 : i32
    %c0_i32_0 = arith.constant 0 : i32
    %c0_i32_1 = arith.constant 0 : i32
    return %c0_i32, %c0_i32_0 : i32, i32
  }
  func.func @transform_2(%arg0: i32) -> (i32, i32) {
    %c0_i32 = arith.constant 0 : i32
    %c0_i32_0 = arith.constant 0 : i32
    %c0_i32_1 = arith.constant 0 : i32
    return %c0_i32, %c0_i32_0 : i32, i32
  }
  func.func @transform_3(%arg0: i32) -> (i32, i32) {
    %c0_i32 = arith.constant 0 : i32
    %c0_i32_0 = arith.constant 0 : i32
    %c0_i32_1 = arith.constant 0 : i32
    return %c0_i32, %c0_i32_0 : i32, i32
  }
  func.func @transform_4(%arg0: i32) -> (i32, i32) {
    %c0_i32 = arith.constant 0 : i32
    %c0_i32_0 = arith.constant 0 : i32
    %c0_i32_1 = arith.constant 0 : i32
    return %c0_i32, %c0_i32_0 : i32, i32
  }
  func.func @transform_5(%arg0: i32) -> (i32, i32) {
    %c0_i32 = arith.constant 0 : i32
    %c0_i32_0 = arith.constant 0 : i32
    return %c0_i32, %arg0 : i32, i32
  }
}

</mosaic_0001>

<bundles_post_ra>
// kernel: tpu_custom_call.1
= control target key start
LH: loop header
LB: loop body
LE: loop exit
PB: predicated region body
PF: predicated region fallthrough
CT: control target
= control target key end

     0   :  { %10 = vsyncpa [#allocation3], 0  ;;  %s1383_s0 = inlined_call_operand.hbm [shape: f32[512,128], index: 0, kind: input, shape index: {}]   ;;  %s1384_s1 = inlined_call_operand.hbm [shape: f32[128,128], index: 1, kind: input, shape index: {}]   ;;  %s1385_s2 = inlined_call_operand.vmem [shape: f32[1,128], index: 2, kind: input, shape index: {}]   ;;  %s1386_s3 = inlined_call_operand.vmem [shape: f32[2,128], index: 3, kind: input, shape index: {}]   ;;  %s1387_s4 = inlined_call_operand.vmem [shape: f32[2,1], index: 4, kind: input, shape index: {}]   ;;  %s1388_s5 = inlined_call_operand.hbm [shape: f32[2,512], index: 5, kind: output, shape index: {}]  }
   0x1   :  { %12 = vsyncpa [#allocation3 + $0x1], 0 }
   0x2   :  { %13 = vsyncpa [#allocation6], 0 }
   0x3   :  { %14 = vsyncpa [#allocation4], 0 }
   0x4   :  { %16 = vsyncpa [#allocation4 + $0x1], 0  ;;  %s1133_s18 = smov 0   ;;  %s1135_s19 = smov 0  }
   0x5   :  { %s1137_s20 = smov 0   ;;  %s1139_s21 = smov 0  }
   0x6 LB: > { %s1154_s22 = sadd.s32 4294967295, %s1092_s21   ;;  %s683_s23 = sadd.s32 4294967294, %s1092_s21   ;;  %s1092_s21 = sphi %s1139_s21, %s1407_s21   ;;  %s1088_s20 = sphi %s1137_s20, %s1406_s20   ;;  %s1084_s19 = sphi %s1135_s19, %s1405_s19   ;;  %s1080_s18 = sphi %s1133_s18, %s1404_s18  }
   0x7   : > { %p42_p0 = scmp.ne.s32.totalorder %s1084_s19, %s1080_s18  ;;  %p1389_p1 = scmp.eq.s32.totalorder %s1154_s22, 0 }
   0x8   : > { %p156_p3 = scmp.eq.s32.totalorder %s683_s23, 3  ;;  %p684_p5 = scmp.ge.s32.totalorder %s1092_s21, 1 }
   0x9   : > { %p1163_p4 = por %p1389_p1, %p42_p0  ;;  %p163_p7 = scmp.lt.s32.totalorder %s1092_s21, 5 }
   0xa   : > { %p1168_p6 = por %p156_p3, %p42_p0  ;;  %s1094_s27 = smov [#allocation5]  }
   0xb   : > { %s1392_s24 = scalar_select %p1163_p4, 1, 0 }
   0xc   : > { %s1393_s25 = scalar_select %p1168_p6, 1, 0 }
   0xd   : > { %p1173_p8 = pnand %p684_p5, %p163_p7  ;;  %s175_s28 = sshll.u32 %s1094_s27, 4  ;;  %s176_s28 = int_to_ptr.vmem [resolvable:$true] %s175_s28 }
   0xe   : > { %s1186_s30 = sadd.s32 1, %s1092_s21   ;;  %s29_s6 = sadd.s32 1, %s1088_s20 }
   0xf   : > { %s1394_s26 = scalar_select %p1173_p8, 1, 0 }
  0x10   : > { %p904_p9 = pneg %p1173_p8  ;;  %s26_s7 = ssub.s32 %s1092_s21, %s1186_s30 }
  0x11   : > { %s964_s10 = scalar_lea.hbm %s1384_s1, 2048 }
  0x12   : > { %p1181_p10 = pnand %p904_p9, %p1389_p1  ;;  %p965_p11 = scmp.ne.s32.totalorder %s1384_s1, %s964_s10 }
  0x13   : > { %p971_p3 = scmp.lt.u32.totalorder %s964_s10, %s1384_s1 }
  0x14   : > { %p966_p12 = pneg %p1181_p10 }
  0x16   : > { %p967_p13 = pnand %p966_p12, %p965_p11 }
  0x18   : > { %p968_p0 = pneg %p967_p13 }
  0x1a   : > { %p973_p5 = pnand %p971_p3, %p968_p0 }
  0x1c   : > { %976 = shalt.err (!%p973_p5)
}
  0x1d   : > { %s977_s15 = scalar_lea.vmem %s176_s28, 2048  ;;  %p985_p2 = scmp.lt.s32.totalorder %s176_s28, %s176_s28 }
  0x1e   : > { %p978_p7 = scmp.ne.s32.totalorder %s176_s28, %s977_s15  ;;  %p986_p6 = scmp.lt.s32.totalorder %s977_s15, %s977_s15 }
  0x20   : > { %p980_p9 = pnand %p978_p7, %p966_p12  ;;  %p987_p4 = por %p986_p6, %p985_p2 }
  0x22   : > { %p981_p1 = pneg %p980_p9 }
  0x24   : > { %p988_p8 = pnand %p987_p4, %p981_p1 }
  0x26   : > { %991 = shalt.err (!%p988_p8)
}
  0x27   : > { %s1095_s16 = smov 128   ;;  %s1096_s17 = smov 8  }
  0x28   : > { %907 = dma.hbm_to_vmem [thread:$0]  (!%p1181_p10), %s1384_s1, 2048, %s176_s28, [#allocation6], %s1095_s16, %s1095_s16, %s1096_s17  }
  0x29   : > { %p27_p1 = scmp.eq.s32.totalorder %s26_s7, 0  ;;  %p36_p2 = scmp.ne.s32.totalorder %s1088_s20, %s1084_s19 }
  0x2a   : > { %p37_p4 = scmp.eq.s32.totalorder %s1092_s21, 0  ;;  %p917_p6 = scmp.lt.s32.totalorder %s1092_s21, 4 }
  0x2b   : > { %s1215_s8 = scalar_select %p27_p1, %s1088_s20, %s29_s6  }
  0x2c   : > { %p38_p8 = por %p37_p4, %p36_p2  ;;  %p1396_p11 = scmp.eq.s32.totalorder %s1154_s22, 3 }
  0x2d   : > { %s198_s29 = sand.u32 1, %s1088_s20   ;;  %s699_s10 = sshll.u32 %s1092_s21, 11 }
  0x2e   : > { %p1219_p12 = por %p1396_p11, %p36_p2  ;;  %s687_s11 = sshll.u32 %s198_s29, 7 }
  0x2f   : > { %s1228_s14 = scalar_lea.hbm %s1383_s0, %s699_s10  ;;  %s202_s28 = scalar_lea.vmem [#allocation2], %s687_s11 }
  0x30   : > { %s209_s6 = sshll.u32 %s202_s28, 4  ;;  %p1230_p10 = pnand %p917_p6, %p38_p8  ;;  %s1234_s6 = int_to_ptr.vmem [resolvable:$true] %s209_s6 }
  0x31   : > { %s1236_s15 = scalar_lea.sflag [#allocation3], %s198_s29  ;;  %s992_s23 = scalar_lea.hbm %s1228_s14, 2048 }
  0x32   : > { %p993_p13 = scmp.ne.s32.totalorder %s1228_s14, %s992_s23  ;;  %p994_p0 = pneg %p1230_p10 }
  0x33   : > { %s997_s11 = scalar_lea.hbm %s1383_s0, 8192  ;;  %p998_p7 = scmp.lt.u32.totalorder %s1228_s14, %s1383_s0 }
  0x34   : > { %p995_p3 = pnand %p994_p0, %p993_p13  ;;  %p999_p9 = scmp.lt.u32.totalorder %s997_s11, %s992_s23 }
  0x35   : > { %p1001_p2 = scmp.lt.u32.totalorder %s992_s23, %s1228_s14 }
  0x36   : > { %p996_p5 = pneg %p995_p3  ;;  %p1000_p1 = por %p999_p9, %p998_p7 }
  0x38   : > { %p1002_p4 = por %p1001_p2, %p1000_p1 }
  0x3a   : > { %p1003_p6 = pnand %p1002_p4, %p996_p5 }
  0x3c   : > { %1006 = shalt.err (!%p1003_p6)
}
  0x3d   : > { %s1007_s29 = scalar_lea.vmem %s1234_s6, 2048  ;;  %s1097_s28 = smov [#allocation2]  }
  0x3e   : > { %p1008_p8 = scmp.ne.s32.totalorder %s1234_s6, %s1007_s29  ;;  %s1012_s27 = sshll.u32 %s1097_s28, 4  ;;  %s1013_s27 = int_to_ptr.vmem [resolvable:$false] %s1012_s27 }
  0x3f   : > { %s1014_s10 = scalar_lea.vmem %s1013_s27, 4096  ;;  %p1015_p3 = scmp.lt.s32.totalorder %s1234_s6, %s1013_s27 }
  0x40   : > { %p1010_p11 = pnand %p1008_p8, %p994_p0  ;;  %p1016_p7 = scmp.lt.s32.totalorder %s1014_s10, %s1007_s29 }
  0x42   : > { %p1011_p13 = pneg %p1010_p11  ;;  %p1017_p9 = por %p1016_p7, %p1015_p3 }
  0x44   : > { %p1018_p1 = pnand %p1017_p9, %p1011_p13 }
  0x46   : > { %1021 = shalt.err (!%p1018_p1)
}
  0x47   : > { %911 = dma.hbm_to_vmem [thread:$0]  (!%p1230_p10), %s1228_s14, 2048, %s1234_s6, %s1236_s15, %s1095_s16, %s1095_s16, %s1096_s17  }
  0x48   : > { %p1399_p0 = scmp.ne.s32.totalorder %s1394_s26, 0 }
  0x49   : > { %s1270_s23 = sand.u32 (!%p1399_p0), 1, %s1084_s19   ;;  %p1400_p5 = scmp.ne.s32.totalorder (!%p1399_p0), %s1392_s24, 0 }
  0x4a   : > { %221 = sbr.rel (%p1399_p0) target bundleno = 685 (0x2ad), region = 40  ;;  %s691_s11 = sshll.u32 (!%p1399_p0), %s1270_s23, 7 }
  0x4b   : > { %s224_s12 = scalar_lea.sflag (!%p1399_p0), [#allocation3], %s1270_s23  ;;  %s1274_s13 = scalar_lea.vmem (!%p1399_p0), [#allocation2], %s691_s11 }
  0x51   : > { %1067 = dma.done.wait (%p1400_p5), %s224_s12, 2048  }
  0x52   : > { %1069 = vsyncadd (%p1400_p5), %s224_s12, 4294965248  ;;  %p1401_p10 = scmp.eq.s32.totalorder %s1154_s22, 0 }
  0x54   : > { %1071 = dma.done.wait (%p1401_p10), [#allocation6], 2048   ;;  %p1402_p2 = pmov %p1401_p10 }
  0x55   : > { %v275_v0 = vld [vmem:[#allocation5] sm:$0xff]  ;;  %v276_v1 = vld [vmem:[#allocation5 + $0x8] sm:$0xff]  ;;  %v277_v2 = vld [vmem:[#allocation5 + $0x10] sm:$0xff]  ;;  %v1098_v40 = vmov 0.0|0.0   ;;  %vm1099_vm0 = vmmov 0   ;;  %v1100_v41 = vmov 0.0  }
  0x56   : > { %1073 = vsyncadd (%p1402_p2), [#allocation6], 4294965248  ;;  %v840_v3 = vpack.c.bf16 %v276_v1, %v275_v0  ;;  %v278_v4 = vld [vmem:[#allocation5 + $0x18] sm:$0xff]  ;;  %v279_v6 = vld [vmem:[#allocation5 + $0x20] sm:$0xff]  ;;  %872 = vmatprep.subr.bf16.mxu1 %v1098_v40  ;;  %837 = vmatprep.mubr.msk.f32.mxu1 %vm1099_vm0, %v1100_v41  ;;  %v1101_v43 = vmov 0   ;;  %s693_s7 = sshll.u32 %s1270_s23, 1 }
  0x57   : > { %v844_v5 = vpack.c.bf16 %v278_v4, %v277_v2  ;;  %v280_v7 = vld [vmem:[#allocation5 + $0x28] sm:$0xff]  ;;  %v259_v9 = vld [vmem:[%s1274_s13] sm:$0xff]  ;;  %v281_v10 = vld [vmem:[#allocation5 + $0x30] sm:$0xff]  ;;  %959 = vset.pattern.permute.xlu0 %v1101_v43  ;;  %s696_s15 = sshll.u32 %s1154_s22, 5  ;;  %s257_s29 = scalar_lea.vmem [#allocation7], %s693_s7 }
  0x58   : > { %841 = vmatprep.subr.bf16.mxu0 %v840_v3  ;;  %v848_v8 = vpack.c.bf16 %v280_v7, %v279_v6  ;;  %v282_v11 = vld [vmem:[#allocation5 + $0x38] sm:$0xff]  ;;  %781 = vmatprep.mubr.f32.mxu0 %v259_v9  ;;  %v283_v13 = vld [vmem:[#allocation5 + $0x40] sm:$0xff]  ;;  %v284_v14 = vld [vmem:[#allocation5 + $0x48] sm:$0xff]  ;;  %s603_s28 = sshll.u32 %s257_s29, 4  ;;  %s1340_s11 = scalar_lea.hbm %s1388_s5, %s696_s15  ;;  %s1342_s28 = int_to_ptr.vmem [resolvable:$true] %s603_s28 }
  0x59   : > { %843 = vmatpush3.bf16.msra.mxu0 %v840_v3  ;;  %v852_v12 = vpack.c.bf16 %v282_v11, %v281_v10  ;;  %v856_v15 = vpack.c.bf16 %v284_v14, %v283_v13  ;;  %v285_v16 = vld [vmem:[#allocation5 + $0x50] sm:$0xff]  ;;  %v286_v17 = vld [vmem:[#allocation5 + $0x58] sm:$0xff]  ;;  %v287_v19 = vld [vmem:[#allocation5 + $0x60] sm:$0xff]  ;;  %s590_s12 = scalar_lea.sflag [#allocation4], %s1270_s23  ;;  %s1102_s22 = smov [#allocation7]  }
  0x5a   : > { %845 = vmatprep.subr.bf16.mxu0 %v844_v5  ;;  %v860_v18 = vpack.c.bf16 %v286_v17, %v285_v16  ;;  %v288_v20 = vld [vmem:[#allocation5 + $0x68] sm:$0xff]  ;;  %v289_v22 = vld [vmem:[#allocation5 + $0x70] sm:$0xff]  ;;  %v290_v23 = vld [vmem:[#allocation5 + $0x78] sm:$0xff]  ;;  %s1026_s24 = sshll.u32 %s1102_s22, 4  ;;  %s1027_s24 = int_to_ptr.vmem [resolvable:$false] %s1026_s24 }
  0x5b   : > { %v864_v21 = vpack.c.bf16 %v288_v20, %v287_v19  ;;  %v868_v24 = vpack.c.bf16 %v290_v23, %v289_v22  ;;  %v260_v25 = vld [vmem:[%s1274_s13 + $0x8] sm:$0xff]  ;;  %v261_v26 = vld [vmem:[%s1274_s13 + $0x10] sm:$0xff]  ;;  %v262_v27 = vld [vmem:[%s1274_s13 + $0x18] sm:$0xff]  ;;  %s1028_s26 = scalar_lea.vmem %s1027_s24, 64  ;;  %p1029_p11 = scmp.lt.s32.totalorder %s1342_s28, %s1027_s24 }
  0x5c   : > { %v263_v28 = vld [vmem:[%s1274_s13 + $0x20] sm:$0xff]  ;;  %v264_v29 = vld [vmem:[%s1274_s13 + $0x28] sm:$0xff]  ;;  %v265_v30 = vld [vmem:[%s1274_s13 + $0x30] sm:$0xff] }
  0x5d   : > { %847 = vmatpush3.bf16.msra.mxu0 %v844_v5  ;;  %v266_v31 = vld [vmem:[%s1274_s13 + $0x38] sm:$0xff]  ;;  %v267_v32 = vld [vmem:[%s1274_s13 + $0x40] sm:$0xff]  ;;  %v268_v33 = vld [vmem:[%s1274_s13 + $0x48] sm:$0xff] }
  0x5e   : > { %849 = vmatprep.subr.bf16.mxu0 %v848_v8  ;;  %v269_v34 = vld [vmem:[%s1274_s13 + $0x50] sm:$0xff]  ;;  %v270_v35 = vld [vmem:[%s1274_s13 + $0x58] sm:$0xff]  ;;  %v271_v36 = vld [vmem:[%s1274_s13 + $0x60] sm:$0xff] }
  0x5f   : > { %v272_v37 = vld [vmem:[%s1274_s13 + $0x68] sm:$0xff]  ;;  %v273_v38 = vld [vmem:[%s1274_s13 + $0x70] sm:$0xff]  ;;  %v274_v39 = vld [vmem:[%s1274_s13 + $0x78] sm:$0xff]  ;;  %s1022_s13 = scalar_lea.vmem %s1342_s28, 32 }
  0x60   : > { %v492_v42 = vld [vmem:[%s1387_s4] sm:$0x3]  ;;  %p1023_p4 = scmp.ne.s32.totalorder %s1342_s28, %s1022_s13  ;;  %p1030_p13 = scmp.lt.s32.totalorder %s1028_s26, %s1022_s13 }
  0x61   : > { %851 = vmatpush3.bf16.msra.mxu0 %v848_v8  ;;  %495 = vperm.xlu0 %959, %v492_v42   ;;  %v1307_v44 = vld [vmem:[%s1385_s2] ss:$0 sm:$0xff] }
  0x62   : > { %853 = vmatprep.subr.bf16.mxu0 %v852_v12  ;;  %p1024_p6 = pnand %p1023_p4, %p1219_p12  ;;  %p1031_p3 = por %p1030_p13, %p1029_p11 }
  0x64   : > { %p1025_p8 = pneg %p1024_p6 }
  0x65   : > { %855 = vmatpush3.bf16.msra.mxu0 %v852_v12 }
  0x66   : > { %857 = vmatprep.subr.bf16.mxu0 %v856_v15  ;;  %p1032_p7 = pnand %p1031_p3, %p1025_p8 }
  0x69   : > { %859 = vmatpush3.bf16.msra.mxu0 %v856_v15 }
  0x6a   : > { %861 = vmatprep.subr.bf16.mxu0 %v860_v18 }
  0x6d   : > { %863 = vmatpush3.bf16.msra.mxu0 %v860_v18 }
  0x6e   : > { %865 = vmatprep.subr.bf16.mxu0 %v864_v21 }
  0x71   : > { %867 = vmatpush3.bf16.msra.mxu0 %v864_v21 }
  0x72   : > { %869 = vmatprep.subr.bf16.mxu0 %v868_v24 }
  0x75   : > { %871 = vmatpush3.bf16.msra.mxu0 %v868_v24 }
  0x78   : > { %782 = vmatmul.mubr.f32.vlgmr.msra.gmra.mrb[0].mxu0 %v260_v25 }
  0x79   : > { %784 = vmatprep.mubr.f32.mxu0 %v261_v26 }
  0x7c   : > { %785 = vmatmul.mubr.f32.gmra.mrb[2].mxu0 %v262_v27 }
  0x7d   : > { %787 = vmatprep.mubr.f32.mxu0 %v263_v28 }
  0x80   : > { %788 = vmatmul.mubr.f32.gmra.mrb[4].mxu0 %v264_v29 }
  0x81   : > { %790 = vmatprep.mubr.f32.mxu0 %v265_v30 }
  0x84   : > { %791 = vmatmul.mubr.f32.gmra.mrb[6].mxu0 %v266_v31 }
  0x85   : > { %793 = vmatprep.mubr.f32.mxu0 %v267_v32 }
  0x88   : > { %794 = vmatmul.mubr.f32.gmra.mrb[8].mxu0 %v268_v33 }
  0x89   : > { %796 = vmatprep.mubr.f32.mxu0 %v269_v34 }
  0x8c   : > { %797 = vmatmul.mubr.f32.gmra.mrb[10].mxu0 %v270_v35 }
  0x8d   : > { %799 = vmatprep.mubr.f32.mxu0 %v271_v36 }
  0x90   : > { %800 = vmatmul.mubr.f32.gmra.mrb[12].mxu0 %v272_v37 }
  0x91   : > { %802 = vmatprep.mubr.f32.mxu0 %v273_v38 }
  0x94   : > { %803 = vmatmul.mubr.f32.gmra.mrb[14].mxu0 %v274_v39 }
 0x14b   : > { %v783_v45 = vpop.f32.mrb[0].mxu0 }
 0x14c   : > { %v370_v46 = vadd.f32 %v783_v45, %v1307_v44  ;;  %v364_v47 = vpop.f32.mrb[1].mxu0 }
 0x14d   : > { %v365_v48 = vadd.f32 %v1307_v44, %v364_v47 }
 0x14e   : > { %v460_v49 = vmul.f32 0.1, %v370_v46  ;;  %vm444_vm1 = vcmp.gt.f32.partialorder %v370_v46, 0.0 }
 0x14f   : > { %v459_v50 = vmul.f32 0.1, %v365_v48  ;;  %v786_v51 = vpop.f32.mrb[2].mxu0  ;;  %vm443_vm2 = vcmp.gt.f32.partialorder %v365_v48, 0.0 }
 0x150   : > { %v380_v52 = vadd.f32 %v786_v51, %v1307_v44  ;;  %v374_v53 = vpop.f32.mrb[3].mxu0  ;;  %v476_v54 = vsel %vm444_vm1, %v370_v46, %v460_v49  ;;  %vm568_vm1 = vcmask 1041408  }
 0x151   : > { %v375_v55 = vadd.f32 %v1307_v44, %v374_v53  ;;  %v475_v56 = vsel %vm443_vm2, %v365_v48, %v459_v50 }
 0x152   : > { %vm446_vm3 = vcmp.gt.f32.partialorder %v380_v52, 0.0  ;;  %v462_v57 = vmul.f32 0.1, %v380_v52  ;;  %v873_v58 = vpack.c.bf16 %v476_v54, %v475_v56 }
 0x153   : > { %vm445_vm4 = vcmp.gt.f32.partialorder %v375_v55, 0.0  ;;  %v461_v59 = vmul.f32 0.1, %v375_v55  ;;  %v789_v60 = vpop.f32.mrb[4].mxu0 }
 0x154   : > { %874 = vmatpush3.bf16.xpose.msra.mxu1 %v873_v58  ;;  %v390_v61 = vadd.f32 %v789_v60, %v1307_v44  ;;  %v384_v62 = vpop.f32.mrb[5].mxu0  ;;  %v478_v63 = vsel %vm446_vm3, %v380_v52, %v462_v57 }
 0x155   : > { %v385_v0 = vadd.f32 %v1307_v44, %v384_v62  ;;  %875 = vmatprep.subr.bf16.mxu1 %v1098_v40  ;;  %v477_v1 = vsel %vm445_vm4, %v375_v55, %v461_v59  ;;  %v496_v55 = vpop.permute.xlu0 %495 }
 0x156   : > { %vm448_vm5 = vcmp.gt.f32.partialorder %v390_v61, 0.0  ;;  %v464_v2 = vmul.f32 0.1, %v390_v61  ;;  %v876_v3 = vpack.c.bf16 %v478_v63, %v477_v1 }
 0x157   : > { %vm447_vm6 = vcmp.gt.f32.partialorder %v385_v0, 0.0  ;;  %v463_v4 = vmul.f32 0.1, %v385_v0  ;;  %v792_v5 = vpop.f32.mrb[6].mxu0 }
 0x158   : > { %v400_v6 = vadd.f32 %v792_v5, %v1307_v44  ;;  %v394_v7 = vpop.f32.mrb[7].mxu0  ;;  %v480_v8 = vsel %vm448_vm5, %v390_v61, %v464_v2 }
 0x159   : > { %v395_v9 = vadd.f32 %v1307_v44, %v394_v7  ;;  %v479_v10 = vsel %vm447_vm6, %v385_v0, %v463_v4 }
 0x15a   : > { %vm450_vm7 = vcmp.gt.f32.partialorder %v400_v6, 0.0  ;;  %v466_v11 = vmul.f32 0.1, %v400_v6  ;;  %v879_v12 = vpack.c.bf16 %v480_v8, %v479_v10 }
 0x15b   : > { %vm449_vm8 = vcmp.gt.f32.partialorder %v395_v9, 0.0  ;;  %v465_v13 = vmul.f32 0.1, %v395_v9  ;;  %v795_v14 = vpop.f32.mrb[8].mxu0 }
 0x15c   : > { %877 = vmatpush3.bf16.xpose.msra.mxu1 %v876_v3  ;;  %v410_v15 = vadd.f32 %v795_v14, %v1307_v44  ;;  %v404_v16 = vpop.f32.mrb[9].mxu0  ;;  %v482_v17 = vsel %vm450_vm7, %v400_v6, %v466_v11 }
 0x15d   : > { %878 = vmatprep.subr.bf16.mxu1 %v1098_v40  ;;  %v405_v18 = vadd.f32 %v1307_v44, %v404_v16  ;;  %v481_v19 = vsel %vm449_vm8, %v395_v9, %v465_v13 }
 0x15e   : > { %vm452_vm9 = vcmp.gt.f32.partialorder %v410_v15, 0.0  ;;  %v468_v20 = vmul.f32 0.1, %v410_v15  ;;  %v882_v21 = vpack.c.bf16 %v482_v17, %v481_v19 }
 0x15f   : > { %vm451_vm10 = vcmp.gt.f32.partialorder %v405_v18, 0.0  ;;  %v467_v22 = vmul.f32 0.1, %v405_v18  ;;  %v798_v23 = vpop.f32.mrb[10].mxu0 }
 0x160   : > { %v420_v24 = vadd.f32 %v798_v23, %v1307_v44  ;;  %v414_v25 = vpop.f32.mrb[11].mxu0  ;;  %v484_v26 = vsel %vm452_vm9, %v410_v15, %v468_v20 }
 0x161   : > { %v415_v27 = vadd.f32 %v1307_v44, %v414_v25  ;;  %v483_v28 = vsel %vm451_vm10, %v405_v18, %v467_v22 }
 0x162   : > { %vm454_vm11 = vcmp.gt.f32.partialorder %v420_v24, 0.0  ;;  %v470_v29 = vmul.f32 0.1, %v420_v24  ;;  %v885_v30 = vpack.c.bf16 %v484_v26, %v483_v28 }
 0x163   : > { %vm453_vm12 = vcmp.gt.f32.partialorder %v415_v27, 0.0  ;;  %v469_v31 = vmul.f32 0.1, %v415_v27  ;;  %v801_v32 = vpop.f32.mrb[12].mxu0 }
 0x164   : > { %880 = vmatpush3.bf16.xpose.msra.mxu1 %v879_v12  ;;  %v430_v33 = vadd.f32 %v801_v32, %v1307_v44  ;;  %v424_v34 = vpop.f32.mrb[13].mxu0  ;;  %v486_v35 = vsel %vm454_vm11, %v420_v24, %v470_v29 }
 0x165   : > { %881 = vmatprep.subr.bf16.mxu1 %v1098_v40  ;;  %v425_v36 = vadd.f32 %v1307_v44, %v424_v34  ;;  %v485_v37 = vsel %vm453_vm12, %v415_v27, %v469_v31 }
 0x166   : > { %vm456_vm13 = vcmp.gt.f32.partialorder %v430_v33, 0.0  ;;  %v472_v38 = vmul.f32 0.1, %v430_v33  ;;  %v888_v39 = vpack.c.bf16 %v486_v35, %v485_v37 }
 0x167   : > { %vm455_vm14 = vcmp.gt.f32.partialorder %v425_v36, 0.0  ;;  %v471_v41 = vmul.f32 0.1, %v425_v36  ;;  %v804_v42 = vpop.f32.mrb[14].mxu0 }
 0x168   : > { %v440_v43 = vadd.f32 %v804_v42, %v1307_v44  ;;  %v434_v45 = vpop.f32.mrb[15].mxu0  ;;  %v488_v46 = vsel %vm456_vm13, %v430_v33, %v472_v38 }
 0x169   : > { %v435_v47 = vadd.f32 %v1307_v44, %v434_v45  ;;  %v487_v48 = vsel %vm455_vm14, %v425_v36, %v471_v41  ;;  %v491_v44 = vld [vmem:[%s1386_s3] sm:$0x3] }
 0x16a   : > { %vm458_vm15 = vcmp.gt.f32.partialorder %v440_v43, 0.0  ;;  %v474_v49 = vmul.f32 0.1, %v440_v43  ;;  %v891_v50 = vpack.c.bf16 %v488_v46, %v487_v48 }
 0x16b   : > { %vm457_vm0 = vcmp.gt.f32.partialorder %v435_v47, 0.0  ;;  %v473_v51 = vmul.f32 0.1, %v435_v47 }
 0x16c   : > { %883 = vmatpush3.bf16.xpose.msra.mxu1 %v882_v21  ;;  %v490_v52 = vsel %vm458_vm15, %v440_v43, %v474_v49 }
 0x16d   : > { %884 = vmatprep.subr.bf16.mxu1 %v1098_v40  ;;  %v489_v53 = vsel %vm457_vm0, %v435_v47, %v473_v51 }
 0x16e   : > { %v894_v54 = vpack.c.bf16 %v490_v52, %v489_v53 }
 0x174   : > { %886 = vmatpush3.bf16.xpose.msra.mxu1 %v885_v30 }
 0x175   : > { %887 = vmatprep.subr.bf16.mxu1 %v1098_v40 }
 0x17c   : > { %889 = vmatpush3.bf16.xpose.msra.mxu1 %v888_v39 }
 0x17d   : > { %890 = vmatprep.subr.bf16.mxu1 %v1098_v40 }
 0x184   : > { %892 = vmatpush3.bf16.xpose.msra.mxu1 %v891_v50 }
 0x185   : > { %893 = vmatprep.subr.bf16.mxu1 %v1098_v40 }
 0x18c   : > { %895 = vmatpush3.bf16.xpose.msra.mxu1 %v894_v54 }
 0x193   : > { %838 = vmatmul.mubr.f32.vlgmr.msra.gmra.mrb[0].mxu1 %v491_v44 }
 0x266   : > { %v564_v56 = vpop.f32.mrb[0].mxu1 }
 0x267   : > { %v565_v57 = vadd.f32 %v564_v56, %v496_v55  ;;  %v839_v58 = vpop.f32.mrb[1].mxu1 }
 0x269   : > { %v569_v59 = vsel %vm568_vm1, %v565_v57, -inf }
 0x26a   : > { %v570_v60 = vrot.slane %v569_v59, 4 }
 0x26c   : > { %v571_v61 = vmax.f32 %v569_v59, %v570_v60 }
 0x26e   : > { %v572_v62 = vrot.slane %v571_v61, 2 }
 0x270   : > { %v573_v63 = vmax.f32 %v571_v61, %v572_v62 }
 0x272   : > { %v574_v0 = vrot.slane %v573_v63, 1 }
 0x274   : > { %v575_v40 = vmax.f32 %v573_v63, %v574_v0 }
 0x276   : > { %v576_v1 = vsub.f32 %v565_v57, %v575_v40 }
 0x278   : > { %v577_v2 = vmul.f32 1.442695, %v576_v1 }
 0x27a   : > { %960 = vpow2.f32 %v577_v2 }
 0x284   : > { %v961_v3 = vpop.eup %960 }
 0x285   : > { %v579_v4 = vsel %vm568_vm1, %v961_v3, 0.0 }
 0x286   : > { %v580_v5 = vrot.slane %v579_v4, 4 }
 0x288   : > { %v581_v6 = vadd.f32 %v580_v5, %v579_v4 }
 0x28a   : > { %v582_v7 = vrot.slane %v581_v6, 2 }
 0x28c   : > { %v583_v8 = vadd.f32 %v582_v7, %v581_v6 }
 0x28e   : > { %v584_v9 = vrot.slane %v583_v8, 1 }
 0x290   : > { %v585_v10 = vadd.f32 %v584_v9, %v583_v8 }
 0x292   : > { %962 = vrcp.f32 %v585_v10 }
 0x29c   : > { %v963_v11 = vpop.eup %962 }
 0x29d   : > { %v587_v12 = vmul.f32 %v963_v11, %v961_v3 }
 0x29f   : > { %588 = vst [vmem:[%s257_s29] sm:$0x3] %v587_v12 }
 0x2a0   : > { %1035 = shalt.err (!%p1032_p7)
}
 0x2a1   : > { %s1036_s23 = scalar_lea.hbm %s1340_s11, 32  ;;  %s1040_s14 = scalar_lea.hbm %s1388_s5, 128 }
 0x2a2   : > { %p1037_p9 = scmp.ne.s32.totalorder %s1340_s11, %s1036_s23  ;;  %p1041_p5 = scmp.lt.u32.totalorder %s1340_s11, %s1388_s5 }
 0x2a3   : > { %p1042_p10 = scmp.lt.u32.totalorder %s1040_s14, %s1036_s23  ;;  %p1044_p4 = scmp.lt.u32.totalorder %s1036_s23, %s1340_s11 }
 0x2a4   : > { %p1038_p1 = pnand %p1037_p9, %p1219_p12 }
 0x2a5   : > { %p1043_p2 = por %p1042_p10, %p1041_p5 }
 0x2a6   : > { %p1039_p0 = pneg %p1038_p1 }
 0x2a7   : > { %p1045_p6 = por %p1044_p4, %p1043_p2 }
 0x2a9   : > { %p1046_p8 = pnand %p1045_p6, %p1039_p0 }
 0x2ab   : > { %1049 = shalt.err (!%p1046_p8)
}
 0x2ac   : > { %902 = dma.vmem_to_hbm [thread:$0]  (%p1219_p12), %s1342_s28, 32, %s1340_s11, %s590_s12  }
 0x2ad PF: > { %p919_p11 = scmp.ge.s32.totalorder %s1092_s21, 2  ;;  %s615_s15 = sand.u32 1, %s1080_s18  }
 0x2ae   : > { %p1403_p13 = scmp.ne.s32.totalorder %s1393_s25, 0  ;;  %s616_s29 = scalar_lea.sflag [#allocation4], %s615_s15 }
 0x2b0   : > { %p913_p3 = pnand %p919_p11, %p1403_p13 }
 0x2b2   : > { %1075 = dma.done.wait (!%p913_p3), %s616_s29, 32  }
 0x2b3   : > { %1077 = vsyncadd (!%p913_p3), %s616_s29, 4294967264  ;;  %p19_p7 = scmp.ge.s32.totalorder %s1186_s30, 6   ;;  %s1404_s18 = smov %s1084_s19 }
 0x2b4   : > { %s1405_s19 = smov %s1088_s20  ;;  %s1406_s20 = smov %s1215_s8 }
 0x2b5   : > { %s1407_s21 = smov %s1186_s30  ;;  %21 = sbr.rel (!%p19_p7) target bundleno = 6 (0x6), region = 89 }
 0x2bc   :  { %621 = vsyncpa [#allocation3], 1 }
 0x2bd   :  { %623 = vsyncpa [#allocation3 + $0x1], 1 }
 0x2be   :  { %624 = vsyncpa [#allocation6], 1 }
 0x2bf   :  { %625 = vsyncpa [#allocation4], 1 }
 0x2c0   :  { %627 = vsyncpa [#allocation4 + $0x1], 1 }

</bundles_post_ra>
